<compile_context>
chip_gen: v7x
topology: tpu7x:2x2x1
jax: 0.10.0
libtpu: 0.0.40
codegen_flags: <defaults>
</compile_context>

<pallas_src>
import numpy as np
import jax
import jax.numpy as jnp
from jax.experimental import pallas as pl
from jax.experimental.pallas import tpu as pltpu

# Small synthetic "Config" (shapes consistent with the module's __init__)
CFG = dict(
    sr=16000,               # config.model.sr
    mel_win=64,             # config.model.mel_win  (n_fft / window length)
    mel_strides=16,         # config.model.mel_strides (hop)
    cutoff_lowpass=60.0,    # config.train.cutoff_lowpass
    cutoff_highpass=7000.0, # config.train.cutoff_highpass
    q_min=2.0, q_max=5.0,   # config.train.q_min / q_max
    num_peak=4,             # config.train.num_peak
)


# --------------------------- Pallas kernel ----------------------------------

def _make_augment_kernel(Tf, Nb, win, hop, padb, Tb):
    """Fused per-batch kernel (time-on-lanes layout):
       frame -> (folded STFT*PEQ*iSTFT) matmul -> overlap-add -> crop ->
       envelope divide -> peak normalize."""
    ratio = win // hop                     # frame overlap factor (4)
    npad = max(0, ratio - 1 - padb)        # missing boundary frames each side (1)

    def kernel(xp_ref, mt_ref, ienv_ref, out_ref):
        # xp_ref : (1, hop, Nb)  polyphase reflect-padded waveform (time on lanes)
        # mt_ref : (1, win, win) transposed folded per-batch filter matrix
        # ienv   : (1, hop, Tb)  1 / OLA squared-window envelope (polyphase, cropped)
        # out    : (1, hop, Tb)  normalized waveform (polyphase layout)
        xp = xp_ref[0]                                                # [hop, Nb]

        # Transposed frames built in registers (lane shifts -> XLU):
        #   framesT[c*hop + s, t] = xpad[(t + c)*hop + s],  t in [0, Tf)
        framesT = jnp.concatenate(
            [xp[:, c:c + Tf] for c in range(ratio)], axis=0)          # [win, Tf]
        # Zero lanes on each side stand in for the non-existent frames
        # t = -1 / t = Tf at the iSTFT boundaries.
        if npad > 0:
            zcol = jnp.zeros((win, npad), jnp.float32)
            framesTp = jnp.concatenate([zcol, framesT, zcol], axis=1)  # [win, Tf+2*npad]
        else:
            framesTp = framesT

        # Single MXU matmul: analysis DFT * diag(PEQ filter) * inverse DFT,
        # analysis + synthesis Hann windows baked into M^T.  Time stays on
        # lanes, so the result and everything downstream is lane-dense.
        yf = jnp.dot(mt_ref[0], framesTp,
                     preferred_element_type=jnp.float32)              # [win, Tf+2*npad]

        # Overlap-add + crop of the STFT padding, all on values (no scratch):
        #   y[s, j] = sum_c yf[c*hop + s, j + padb - c + npad],  j in [0, Tb)
        y = None
        for c in range(ratio):
            start = padb - c + npad
            contrib = yf[c * hop:(c + 1) * hop, start:start + Tb]     # [hop, Tb]
            y = contrib if y is None else y + contrib

        # torch.istft squared-window envelope division.
        y = y * ienv_ref[0]                                           # [hop, Tb]

        # Per-waveform peak normalization (whole waveform resident per block).
        peak = jnp.max(jnp.abs(y), axis=1, keepdims=True)             # [hop, 1]
        peak = jnp.max(peak, axis=0, keepdims=True)                   # [1, 1]
        out_ref[0] = y * (1.0 / jnp.maximum(peak, 1e-7))

    return kernel


# ----------------------- biquad / PEQ responses (glue) ----------------------

def _biquad_response(b, a, win):
    """rfft(b, win) / rfft(a, win) for length-3 coefficient vectors."""
    F = win // 2 + 1
    wk = 2.0 * jnp.pi * jnp.arange(F).astype(jnp.float32) / win
    z1 = jnp.exp(-1j * wk)
    z2 = jnp.exp(-2j * wk)
    num = b[..., 0:1] + b[..., 1:2] * z1 + b[..., 2:3] * z2
    den = a[..., 0:1] + a[..., 1:2] * z1 + a[..., 2:3] * z2
    return num / den


def _peaking(center, gain, q, sr, win):
    omega = 2.0 * jnp.pi * center / sr
    cos, sin = jnp.cos(omega), jnp.sin(omega)
    alpha = sin / (2.0 * q)
    A = jnp.exp(gain / 40.0 * np.log(10.0))
    b = jnp.stack([1.0 + alpha * A, -2.0 * cos, 1.0 - alpha * A], axis=-1)
    a = jnp.stack([1.0 + alpha / A, -2.0 * cos, 1.0 - alpha / A], axis=-1)
    return _biquad_response(b, a, win)


def _low_shelving(cutoff, gain, q, sr, win):
    omega = 2.0 * np.pi * cutoff / sr
    cos, sin = np.cos(omega), np.sin(omega)
    alpha = sin / (2.0 * q)
    A = jnp.exp(gain / 40.0 * np.log(10.0))
    sA = 2.0 * jnp.sqrt(A) * alpha
    b = jnp.stack([A * ((A + 1.0) - (A - 1.0) * cos + sA),
                   2.0 * A * ((A - 1.0) - (A + 1.0) * cos),
                   A * ((A + 1.0) - (A - 1.0) * cos - sA)], axis=-1)
    a = jnp.stack([(A + 1.0) + (A - 1.0) * cos + sA,
                   -2.0 * ((A - 1.0) + (A + 1.0) * cos),
                   (A + 1.0) + (A - 1.0) * cos - sA], axis=-1)
    return _biquad_response(b, a, win)


def _high_shelving(cutoff, gain, q, sr, win):
    omega = 2.0 * np.pi * cutoff / sr
    cos, sin = np.cos(omega), np.sin(omega)
    alpha = sin / (2.0 * q)
    A = jnp.exp(gain / 40.0 * np.log(10.0))
    sA = 2.0 * jnp.sqrt(A) * alpha
    b = jnp.stack([A * ((A + 1.0) + (A - 1.0) * cos + sA),
                   -2.0 * A * ((A - 1.0) + (A + 1.0) * cos),
                   A * ((A + 1.0) + (A - 1.0) * cos - sA)], axis=-1)
    a = jnp.stack([(A + 1.0) - (A - 1.0) * cos + sA,
                   2.0 * ((A - 1.0) - (A + 1.0) * cos),
                   (A + 1.0) - (A - 1.0) * cos - sA], axis=-1)
    return _biquad_response(b, a, win)


# ------------------------------ forward --------------------------------------

def augment_forward(wavs, quality_power, gain, cfg=CFG):
    B, T = wavs.shape
    win, hop, sr = cfg["mel_win"], cfg["mel_strides"], cfg["sr"]
    assert win % hop == 0 and T % hop == 0, "demo assumes hop | win and hop | T"
    F = win // 2 + 1
    pad = win // 2
    Tpad = T + 2 * pad
    Nb = Tpad // hop                    # hop-blocks of the padded waveform
    Tf = 1 + (Tpad - win) // hop        # number of STFT frames
    Tb = T // hop                       # hop-blocks of the output
    padb = pad // hop                   # crop offset in hop-blocks

    # ----- host constants: periodic Hann window, (i)DFT matrices, OLA envelope -----
    n = np.arange(win)
    window = 0.5 * (1.0 - np.cos(2.0 * np.pi * n / win))            # periodic hann
    k = np.arange(F)
    ang = 2.0 * np.pi * np.outer(n, k) / win                        # [win, F]
    cw = window[:, None] * np.cos(ang)                              # analysis (real)
    sw = -window[:, None] * np.sin(ang)                             # analysis (imag)
    ck = np.where((k == 0) | (k == win // 2), 1.0, 2.0)             # hermitian doubling
    ic = (ck[:, None] * np.cos(ang.T) / win) * window[None, :]      # synthesis (real)
    is_ = (-ck[:, None] * np.sin(ang.T) / win) * window[None, :]    # synthesis (imag)

    env = np.zeros(Tpad, np.float64)
    wsq = window ** 2
    for t in range(Tf):
        env[t * hop:t * hop + win] += wsq
    inv_env = (1.0 / np.maximum(env[pad:pad + T], 1e-11)).astype(np.float32)
    # polyphase layout: [hop, Tb]  (time hop-block index on lanes)
    inv_env_poly = jnp.asarray(
        np.ascontiguousarray(inv_env.reshape(Tb, hop).T).reshape(1, hop, Tb))

    # ----- parametric equalizer frequency response (tiny, XLA glue) -----
    f_min, f_max, peaks = cfg["cutoff_lowpass"], cfg["cutoff_highpass"], cfg["num_peak"]
    peak_centers = f_min * (f_max / f_min) ** (np.arange(1, peaks + 1) / (peaks + 1))
    q = cfg["q_min"] * (cfg["q_max"] / cfg["q_min"]) ** quality_power      # [B, peaks+2]
    center = jnp.broadcast_to(jnp.asarray(peak_centers, jnp.float32)[None], (B, peaks))
    peak_resp = _peaking(center, gain[:, :-2], q[:, :-2], sr, win)         # [B, peaks, F]
    filters = (jnp.prod(peak_resp, axis=1)
               * _high_shelving(f_max, gain[:, -1], q[:, -1], sr, win)
               * _low_shelving(f_min, gain[:, -2], q[:, -2], sr, win))     # [B, F] complex
    fr = jnp.real(filters).astype(jnp.float32)                             # [B, F]
    fi = jnp.imag(filters).astype(jnp.float32)                             # [B, F]

    # ----- fold analysis-DFT -> diag(filter) -> inverse-DFT into one transposed
    #       [win, win] matrix per batch (kernel computes M^T @ framesT) -----
    cwj, swj = jnp.asarray(cw, jnp.float32), jnp.asarray(sw, jnp.float32)  # [win, F]
    icj, isj = jnp.asarray(ic, jnp.float32), jnp.asarray(is_, jnp.float32) # [F, win]
    right_r = fr[:, :, None] * icj + fi[:, :, None] * isj                  # [B, F, win]
    right_i = fr[:, :, None] * isj - fi[:, :, None] * icj                  # [B, F, win]
    MT = (jnp.einsum('wf,bfv->bvw', cwj, right_r)
          + jnp.einsum('wf,bfv->bvw', swj, right_i)).astype(jnp.float32)   # [B, win, win]

    # ----- reflect pad (torch.stft center=True) + polyphase layout (XLA plumbing) -----
    xpad = jnp.pad(wavs.astype(jnp.float32), ((0, 0), (pad, pad)), mode="reflect")
    xpoly = jnp.transpose(xpad.reshape(B, Nb, hop), (0, 2, 1))             # [B, hop, Nb]

    # ----- single fused Pallas kernel, gridded over the batch -----
    kernel = _make_augment_kernel(Tf, Nb, win, hop, padb, Tb)
    cost = pl.CostEstimate(
        flops=2 * B * win * win * (Tf + 2),
        transcendentals=0,
        bytes_accessed=4 * (B * hop * Nb + B * win * win + hop * Tb + B * hop * Tb),
    )
    out_poly = pl.pallas_call(
        kernel,
        out_shape=jax.ShapeDtypeStruct((B, hop, Tb), jnp.float32),
        grid_spec=pltpu.PrefetchScalarGridSpec(
            num_scalar_prefetch=0,
            grid=(B,),
            in_specs=[
                pl.BlockSpec((1, hop, Nb), lambda b: (b, 0, 0)),   # polyphase waveform
                pl.BlockSpec((1, win, win), lambda b: (b, 0, 0)),  # folded filter matrix^T
                pl.BlockSpec((1, hop, Tb), lambda b: (0, 0, 0)),   # 1 / OLA envelope
            ],
            out_specs=pl.BlockSpec((1, hop, Tb), lambda b: (b, 0, 0)),
        ),
        compiler_params=pltpu.CompilerParams(
            dimension_semantics=("parallel",),
            vmem_limit_bytes=32 * 1024 * 1024),
        cost_estimate=cost,
    )(xpoly, MT, inv_env_poly)

    # back to natural [B, T] layout (cheap wrapper-side layout plumbing)
    out = jnp.transpose(out_poly, (0, 2, 1)).reshape(B, T)

    # TODO(synk): Praat-based pitch/formant augmentation (parselmouth resynthesis)
    # has no Pallas equivalent; this is the module's exact output when the
    # pitch/formant shift arguments are None.
    return out


if __name__ == "__main__":
    key = jax.random.PRNGKey(0)
    k1, k2, k3 = jax.random.split(key, 3)
    B, T = 2, 256
    peaks = CFG["num_peak"]
    wavs = jax.random.normal(k1, (B, T), dtype=jnp.float32) * 0.1
    quality_power = jax.random.uniform(k2, (B, peaks + 2), dtype=jnp.float32)
    gain = jax.random.uniform(k3, (B, peaks + 2), dtype=jnp.float32,
                              minval=-6.0, maxval=6.0)

    out = augment_forward(wavs, quality_power, gain)
    out = jax.block_until_ready(out)

    assert out.shape == (B, T), out.shape
    assert out.dtype == jnp.float32
    assert bool(jnp.all(jnp.isfinite(out)))
    print("KERNEL_OK")
</pallas_src>

<mosaic_0001>
module attributes {stable_mosaic.version = 11 : i64} {
  func.func @kernel(%arg0: i32, %arg1: memref<1x16x20xf32, #tpu.memory_space<vmem>>, %arg2: memref<1x64x64xf32, #tpu.memory_space<vmem>>, %arg3: memref<1x16x16xf32, #tpu.memory_space<vmem>>, %arg4: memref<1x16x16xf32, #tpu.memory_space<vmem>>) attributes {dimension_semantics = [#tpu.dimension_semantics<parallel>], iteration_bounds = array<i64: 2>, scalar_prefetch = 0 : i64, scratch_operands = 0 : i64, tpu.core_type = #tpu.core_type<tc>, window_params = [{transform_indices = @transform_0, window_bounds = array<i64: 1, 16, 20>}, {transform_indices = @transform_1, window_bounds = array<i64: 1, 64, 64>}, {pipeline_mode = #tpu.pipeline_mode<synchronous>, transform_indices = @transform_2, window_bounds = array<i64: 1, 16, 16>}, {transform_indices = @transform_3, window_bounds = array<i64: 1, 16, 16>}]} {
    %c0 = arith.constant 0 : index
    %c0_0 = arith.constant 0 : index
    %c0_1 = arith.constant 0 : index
    %0 = vector.load %arg1[%c0, %c0_0, %c0_1] : memref<1x16x20xf32, #tpu.memory_space<vmem>>, vector<1x16x20xf32>
    %1 = vector.shape_cast %0 : vector<1x16x20xf32> to vector<16x20xf32>
    %2 = vector.extract_strided_slice %1 {offsets = [0, 0], sizes = [16, 17], strides = [1, 1]} : vector<16x20xf32> to vector<16x17xf32>
    %3 = vector.extract_strided_slice %1 {offsets = [0, 1], sizes = [16, 17], strides = [1, 1]} : vector<16x20xf32> to vector<16x17xf32>
    %4 = vector.extract_strided_slice %1 {offsets = [0, 2], sizes = [16, 17], strides = [1, 1]} : vector<16x20xf32> to vector<16x17xf32>
    %5 = vector.extract_strided_slice %1 {offsets = [0, 3], sizes = [16, 17], strides = [1, 1]} : vector<16x20xf32> to vector<16x17xf32>
    %6 = tpu.concatenate %2, %3, %4, %5 in 0 : vector<16x17xf32>, vector<16x17xf32>, vector<16x17xf32>, vector<16x17xf32> -> vector<64x17xf32>
    %cst = arith.constant 0.000000e+00 : f32
    %7 = vector.broadcast %cst : f32 to vector<64x1xf32>
    %8 = tpu.concatenate %7, %6, %7 in 1 : vector<64x1xf32>, vector<64x17xf32>, vector<64x1xf32> -> vector<64x19xf32>
    %c0_2 = arith.constant 0 : index
    %c0_3 = arith.constant 0 : index
    %c0_4 = arith.constant 0 : index
    %9 = vector.load %arg2[%c0_2, %c0_3, %c0_4] : memref<1x64x64xf32, #tpu.memory_space<vmem>>, vector<1x64x64xf32>
    %10 = vector.shape_cast %9 : vector<1x64x64xf32> to vector<64x64xf32>
    %cst_5 = arith.constant dense<0.000000e+00> : vector<64x19xf32>
    %11 = tpu.matmul %10, %8, %cst_5 {dimension_numbers = #tpu.dot_dimension_numbers<[1], [0], [0], [1], [0, 0, 1, 1], [], []>} : vector<64x64xf32>, vector<64x19xf32>, vector<64x19xf32> -> vector<64x19xf32>
    %12 = vector.extract_strided_slice %11 {offsets = [0, 3], sizes = [16, 16], strides = [1, 1]} : vector<64x19xf32> to vector<16x16xf32>
    %13 = vector.extract_strided_slice %11 {offsets = [16, 2], sizes = [16, 16], strides = [1, 1]} : vector<64x19xf32> to vector<16x16xf32>
    %14 = arith.addf %12, %13 : vector<16x16xf32>
    %15 = vector.extract_strided_slice %11 {offsets = [32, 1], sizes = [16, 16], strides = [1, 1]} : vector<64x19xf32> to vector<16x16xf32>
    %16 = arith.addf %14, %15 : vector<16x16xf32>
    %17 = vector.extract_strided_slice %11 {offsets = [48, 0], sizes = [16, 16], strides = [1, 1]} : vector<64x19xf32> to vector<16x16xf32>
    %18 = arith.addf %16, %17 : vector<16x16xf32>
    %c0_6 = arith.constant 0 : index
    %c0_7 = arith.constant 0 : index
    %c0_8 = arith.constant 0 : index
    %19 = vector.load %arg3[%c0_6, %c0_7, %c0_8] : memref<1x16x16xf32, #tpu.memory_space<vmem>>, vector<1x16x16xf32>
    %20 = vector.shape_cast %19 : vector<1x16x16xf32> to vector<16x16xf32>
    %21 = arith.mulf %18, %20 : vector<16x16xf32>
    %22 = math.absf %21 : vector<16x16xf32>
    %cst_9 = arith.constant dense<0xFF800000> : vector<16xf32>
    %23 = vector.multi_reduction <maximumf>, %22, %cst_9 [1] : vector<16x16xf32> to vector<16xf32>
    %24 = vector.shape_cast %23 : vector<16xf32> to vector<16x1xf32>
    %cst_10 = arith.constant dense<0xFF800000> : vector<1xf32>
    %25 = vector.multi_reduction <maximumf>, %24, %cst_10 [0] : vector<16x1xf32> to vector<1xf32>
    %26 = vector.shape_cast %25 : vector<1xf32> to vector<1x1xf32>
    %cst_11 = arith.constant 1.000000e-07 : f32
    %27 = vector.broadcast %cst_11 : f32 to vector<1x1xf32>
    %28 = arith.maximumf %26, %27 : vector<1x1xf32>
    %cst_12 = arith.constant 1.000000e+00 : f32
    %29 = vector.broadcast %cst_12 : f32 to vector<1x1xf32>
    %30 = arith.divf %29, %28 : vector<1x1xf32>
    %31 = vector.broadcast %30 : vector<1x1xf32> to vector<16x16xf32>
    %32 = arith.mulf %21, %31 : vector<16x16xf32>
    %c0_13 = arith.constant 0 : index
    %c0_14 = arith.constant 0 : index
    %c0_15 = arith.constant 0 : index
    %33 = vector.load %arg4[%c0_13, %c0_14, %c0_15] : memref<1x16x16xf32, #tpu.memory_space<vmem>>, vector<1x16x16xf32>
    %34 = vector.shape_cast %33 : vector<1x16x16xf32> to vector<16x16xf32>
    %35 = vector.shape_cast %32 : vector<16x16xf32> to vector<1x16x16xf32>
    tpu.vector_store %arg4[%c0_13, %c0_14, %c0_15], %35 {strides = array<i32>} : memref<1x16x16xf32, #tpu.memory_space<vmem>>, vector<1x16x16xf32>,
    return
  }
  func.func @transform_0(%arg0: i32) -> (i32, i32, i32) {
    %c0_i32 = arith.constant 0 : i32
    %c0_i32_0 = arith.constant 0 : i32
    %c0_i32_1 = arith.constant 0 : i32
    return %arg0, %c0_i32, %c0_i32_0 : i32, i32, i32
  }
  func.func @transform_1(%arg0: i32) -> (i32, i32, i32) {
    %c0_i32 = arith.constant 0 : i32
    %c0_i32_0 = arith.constant 0 : i32
    %c0_i32_1 = arith.constant 0 : i32
    return %arg0, %c0_i32, %c0_i32_0 : i32, i32, i32
  }
  func.func @transform_2(%arg0: i32) -> (i32, i32, i32) {
    %c0_i32 = arith.constant 0 : i32
    %c0_i32_0 = arith.constant 0 : i32
    %c0_i32_1 = arith.constant 0 : i32
    %c0_i32_2 = arith.constant 0 : i32
    return %c0_i32, %c0_i32_0, %c0_i32_1 : i32, i32, i32
  }
  func.func @transform_3(%arg0: i32) -> (i32, i32, i32) {
    %c0_i32 = arith.constant 0 : i32
    %c0_i32_0 = arith.constant 0 : i32
    %c0_i32_1 = arith.constant 0 : i32
    return %arg0, %c0_i32, %c0_i32_0 : i32, i32, i32
  }
}

</mosaic_0001>

<bundles_post_ra>
// kernel: tpu_custom_call.1
= control target key start
LH: loop header
LB: loop body
LE: loop exit
PB: predicated region body
PF: predicated region fallthrough
CT: control target
= control target key end

     0   :  { %s1386_s0 = inlined_call_operand.hbm [shape: f32[2,16,20], index: 0, kind: input, shape index: {}]   ;;  %s1387_s1 = inlined_call_operand.hbm [shape: f32[2,64,64], index: 1, kind: input, shape index: {}]   ;;  %s1388_s2 = inlined_call_operand.hbm [shape: f32[1,16,16], index: 2, kind: input, shape index: {}]   ;;  %s1389_s3 = inlined_call_operand.hbm [shape: f32[2,16,16], index: 3, kind: output, shape index: {}]  }
   0x1   :  { %1393 = sst [smem:[#allocation13_spill]] %s1386_s0 }
   0x2   :  { %8 = vsyncpa [#allocation3], 0 }
   0x3   :  { %10 = vsyncpa [#allocation3 + $0x1], 0 }
   0x4   :  { %11 = vsyncpa [#allocation6], 0 }
   0x5   :  { %13 = vsyncpa [#allocation6 + $0x1], 0 }
   0x6   :  { %14 = vsyncpa [#allocation4], 0 }
   0x7   :  { %16 = vsyncpa [#allocation4 + $0x1], 0  ;;  %s1054_s12 = smov 0   ;;  %s1056_s13 = smov 0  }
   0x8   :  { %s1058_s14 = smov 0   ;;  %s1060_s15 = smov 0  }
   0x9 LB: > { %s1075_s16 = sadd.s32 4294967295, %s1018_s15   ;;  %s632_s17 = sadd.s32 4294967294, %s1018_s15   ;;  %s1018_s15 = sphi %s1060_s15, %s1413_s15   ;;  %s1014_s14 = sphi %s1058_s14, %s1412_s14   ;;  %s1010_s13 = sphi %s1056_s13, %s1411_s13   ;;  %s1006_s12 = sphi %s1054_s12, %s1410_s12  }
   0xa   : > { %p42_p0 = scmp.ne.s32.totalorder %s1010_s13, %s1006_s12  ;;  %p1390_p1 = scmp.eq.s32.totalorder %s1075_s16, 0 }
   0xb   : > { %p119_p3 = scmp.eq.s32.totalorder %s632_s17, 1  ;;  %p633_p5 = scmp.ge.s32.totalorder %s1018_s15, 1 }
   0xc   : > { %p1084_p4 = por %p1390_p1, %p42_p0  ;;  %p126_p7 = scmp.lt.s32.totalorder %s1018_s15, 3 }
   0xd   : > { %p1089_p6 = por %p119_p3, %p42_p0  ;;  %s1020_s21 = smov [#allocation7]  }
   0xe   : > { %s1394_s18 = scalar_select %p1084_p4, 1, 0 }
   0xf   : > { %s1395_s19 = scalar_select %p1089_p6, 1, 0 }
  0x10   : > { %p1094_p8 = pnand %p633_p5, %p126_p7  ;;  %s138_s22 = sshll.u32 %s1020_s21, 4  ;;  %s1098_s22 = int_to_ptr.vmem [resolvable:$true] %s138_s22 }
  0x11   : > { %s1110_s24 = sadd.s32 1, %s1018_s15   ;;  %s29_s25 = sadd.s32 1, %s1014_s14 }
  0x12   : > { %s1396_s20 = scalar_select %p1094_p8, 1, 0 }
  0x13   : > { %p757_p9 = pneg %p1094_p8  ;;  %s26_s26 = ssub.s32 %s1018_s15, %s1110_s24 }
  0x14   : > { %s856_s29 = scalar_lea.hbm %s1388_s2, 256 }
  0x15   : > { %p1105_p11 = pnand %p757_p9, %p1390_p1  ;;  %p857_p12 = scmp.ne.s32.totalorder %s1388_s2, %s856_s29 }
  0x16   : > { %p863_p5 = scmp.lt.u32.totalorder %s856_s29, %s1388_s2 }
  0x17   : > { %p858_p13 = pneg %p1105_p11 }
  0x19   : > { %p859_p0 = pnand %p858_p13, %p857_p12 }
  0x1b   : > { %p860_p3 = pneg %p859_p0 }
  0x1d   : > { %p865_p7 = pnand %p863_p5, %p860_p3 }
  0x1f   : > { %868 = shalt.err (!%p865_p7)
}
  0x20   : > { %s869_s7 = scalar_lea.vmem %s1098_s22, 256  ;;  %p877_p2 = scmp.lt.s32.totalorder %s1098_s22, %s1098_s22 }
  0x21   : > { %p870_p9 = scmp.ne.s32.totalorder %s1098_s22, %s869_s7  ;;  %p878_p6 = scmp.lt.s32.totalorder %s869_s7, %s869_s7 }
  0x23   : > { %p872_p10 = pnand %p870_p9, %p858_p13  ;;  %p879_p4 = por %p878_p6, %p877_p2 }
  0x25   : > { %p873_p1 = pneg %p872_p10 }
  0x27   : > { %p880_p8 = pnand %p879_p4, %p873_p1 }
  0x29   : > { %883 = shalt.err (!%p880_p8)
}
  0x2a   : > { %s1021_s8 = smov 128   ;;  %s1022_s9 = smov 8  }
  0x2b   : > { %760 = dma.hbm_to_vmem [thread:$0]  (!%p1105_p11), %s1388_s2, 256, %s1098_s22, [#allocation6], %s1021_s8, %s1021_s8, %s1022_s9  }
  0x2c   : > { %p27_p1 = scmp.eq.s32.totalorder %s26_s26, 0  ;;  %p36_p2 = scmp.ne.s32.totalorder %s1014_s14, %s1010_s13 }
  0x2d   : > { %p37_p4 = scmp.eq.s32.totalorder %s1018_s15, 0  ;;  %p773_p6 = scmp.lt.s32.totalorder %s1018_s15, 2 }
  0x2e   : > { %s1144_s17 = scalar_select %p27_p1, %s1014_s14, %s29_s25  }
  0x2f   : > { %p38_p8 = por %p37_p4, %p36_p2  ;;  %p1398_p10 = scmp.eq.s32.totalorder %s1075_s16, 1 }
  0x30   : > { %s1153_s23 = sand.u32 1, %s1014_s14   ;;  %s668_s27 = sshll.u32 %s1018_s15, 8 }
  0x31   : > { %p1148_p12 = por %p1398_p10, %p36_p2  ;;  %s636_s28 = sshll.u32 %s1153_s23, 4 }
  0x32   : > { %s1400_s0 = sld [smem:[#allocation13_spill]]  ;;  %s156_s25 = scalar_lea.vmem [#allocation2], %s636_s28 }
  0x33   : > { %s163_s30 = sshll.u32 %s156_s25, 4  ;;  %p1162_p11 = pnand %p773_p6, %p38_p8  ;;  %s1166_s30 = int_to_ptr.vmem [resolvable:$true] %s163_s30 }
  0x34   : > { %s173_s5 = sand.u32 1, %s1018_s15   ;;  %s153_s6 = scalar_lea.sflag [#allocation3], %s1153_s23 }
  0x35   : > { %p886_p0 = pneg %p1162_p11 }
  0x38   : > { %s1160_s26 = scalar_lea.hbm %s1400_s0, %s668_s27  ;;  %s889_s27 = scalar_lea.hbm %s1400_s0, 512 }
  0x39   : > { %s884_s7 = scalar_lea.hbm %s1160_s26, 256  ;;  %p890_p7 = scmp.lt.u32.totalorder %s1160_s26, %s1400_s0 }
  0x3a   : > { %p885_p13 = scmp.ne.s32.totalorder %s1160_s26, %s884_s7  ;;  %p891_p9 = scmp.lt.u32.totalorder %s889_s27, %s884_s7 }
  0x3b   : > { %p893_p2 = scmp.lt.u32.totalorder %s884_s7, %s1160_s26 }
  0x3c   : > { %p887_p3 = pnand %p886_p0, %p885_p13  ;;  %p892_p1 = por %p891_p9, %p890_p7 }
  0x3e   : > { %p888_p5 = pneg %p887_p3  ;;  %p894_p4 = por %p893_p2, %p892_p1 }
  0x40   : > { %p895_p6 = pnand %p894_p4, %p888_p5 }
  0x42   : > { %898 = shalt.err (!%p895_p6)
}
  0x43   : > { %s899_s29 = scalar_lea.vmem %s1166_s30, 256  ;;  %s1023_s25 = smov [#allocation2]  }
  0x44   : > { %p900_p8 = scmp.ne.s32.totalorder %s1166_s30, %s899_s29  ;;  %s904_s10 = sshll.u32 %s1023_s25, 4  ;;  %s905_s10 = int_to_ptr.vmem [resolvable:$false] %s904_s10 }
  0x45   : > { %s906_s11 = scalar_lea.vmem %s905_s10, 512  ;;  %p907_p3 = scmp.lt.s32.totalorder %s1166_s30, %s905_s10 }
  0x46   : > { %p902_p10 = pnand %p900_p8, %p886_p0  ;;  %p908_p7 = scmp.lt.s32.totalorder %s906_s11, %s899_s29 }
  0x48   : > { %p903_p13 = pneg %p902_p10  ;;  %p909_p9 = por %p908_p7, %p907_p3 }
  0x4a   : > { %p910_p1 = pnand %p909_p9, %p903_p13 }
  0x4c   : > { %913 = shalt.err (!%p910_p1)
}
  0x4d   : > { %764 = dma.hbm_to_vmem [thread:$0]  (!%p1162_p11), %s1160_s26, 256, %s1166_s30, %s153_s6, %s1021_s8, %s1021_s8, %s1022_s9  }
  0x4e   : > { %s639_s7 = sshll.u32 %s1153_s23, 6  ;;  %s669_s27 = sshll.u32 %s1018_s15, 10 }
  0x4f   : > { %s1205_s29 = scalar_lea.hbm %s1387_s1, %s669_s27  ;;  %s177_s25 = scalar_lea.vmem [#allocation5], %s639_s7 }
  0x50   : > { %s184_s10 = sshll.u32 %s177_s25, 4  ;;  %s1211_s11 = scalar_lea.sflag [#allocation6], %s173_s5  ;;  %s1207_s10 = int_to_ptr.vmem [resolvable:$true] %s184_s10 }
  0x51   : > { %s914_s0 = scalar_lea.hbm %s1205_s29, 1024  ;;  %s919_s30 = scalar_lea.hbm %s1387_s1, 2048 }
  0x52   : > { %p915_p5 = scmp.ne.s32.totalorder %s1205_s29, %s914_s0  ;;  %p920_p6 = scmp.lt.u32.totalorder %s1205_s29, %s1387_s1 }
  0x53   : > { %p921_p8 = scmp.lt.u32.totalorder %s919_s30, %s914_s0  ;;  %p923_p13 = scmp.lt.u32.totalorder %s914_s0, %s1205_s29 }
  0x54   : > { %p917_p2 = pnand %p915_p5, %p886_p0 }
  0x55   : > { %p922_p10 = por %p921_p8, %p920_p6 }
  0x56   : > { %p918_p4 = pneg %p917_p2 }
  0x57   : > { %p924_p3 = por %p923_p13, %p922_p10 }
  0x59   : > { %p925_p7 = pnand %p924_p3, %p918_p4 }
  0x5b   : > { %928 = shalt.err (!%p925_p7)
}
  0x5c   : > { %s929_s5 = scalar_lea.vmem %s1207_s10, 1024  ;;  %s1024_s7 = smov [#allocation5]  }
  0x5d   : > { %p930_p9 = scmp.ne.s32.totalorder %s1207_s10, %s929_s5  ;;  %s934_s28 = sshll.u32 %s1024_s7, 4  ;;  %s935_s28 = int_to_ptr.vmem [resolvable:$false] %s934_s28 }
  0x5e   : > { %s936_s22 = scalar_lea.vmem %s935_s28, 2048  ;;  %p937_p2 = scmp.lt.s32.totalorder %s1207_s10, %s935_s28 }
  0x5f   : > { %p932_p1 = pnand %p930_p9, %p886_p0  ;;  %p938_p6 = scmp.lt.s32.totalorder %s936_s22, %s929_s5 }
  0x61   : > { %p933_p5 = pneg %p932_p1  ;;  %p939_p8 = por %p938_p6, %p937_p2 }
  0x63   : > { %p940_p10 = pnand %p939_p8, %p933_p5 }
  0x65   : > { %943 = shalt.err (!%p940_p10)
}
  0x66   : > { %767 = dma.hbm_to_vmem [thread:$0]  (!%p1162_p11), %s1205_s29, 1024, %s1207_s10, %s1211_s11, %s1021_s8, %s1021_s8, %s1022_s9  }
  0x67   : > { %p1402_p0 = scmp.ne.s32.totalorder %s1396_s20, 0 }
  0x68   : > { %s1243_s0 = sand.u32 (!%p1402_p0), 1, %s1010_s13   ;;  %p1403_p4 = scmp.ne.s32.totalorder (!%p1402_p0), %s1394_s18, 0 }
  0x69   : > { %196 = sbr.rel (%p1402_p0) target bundleno = 1015 (0x3f7), region = 32  ;;  %s643_s25 = sshll.u32 (!%p1402_p0), %s1243_s0, 4 }
  0x6a   : > { %s199_s23 = scalar_lea.sflag (!%p1402_p0), [#allocation3], %s1243_s0  ;;  %s202_s4 = scalar_lea.vmem (!%p1402_p0), [#allocation2], %s643_s25 }
  0x70   : > { %989 = dma.done.wait (%p1403_p4), %s199_s23, 256  }
  0x71   : > { %991 = vsyncadd (%p1403_p4), %s199_s23, 4294967040  ;;  %s207_s20 = sand.u32 1, %s1075_s16   ;;  %s644_s8 = sshll.u32 %s1243_s0, 6 }
  0x72   : > { %s208_s9 = scalar_lea.sflag [#allocation6], %s207_s20  ;;  %s1255_s29 = scalar_lea.vmem [#allocation5], %s644_s8 }
  0x73   : > { %993 = dma.done.wait (%p1403_p4), %s208_s9, 1024  }
  0x74   : > { %995 = vsyncadd (%p1403_p4), %s208_s9, 4294966272  ;;  %p1404_p11 = scmp.eq.s32.totalorder %s1075_s16, 0 }
  0x76   : > { %997 = dma.done.wait (%p1404_p11), [#allocation6], 256   ;;  %p1405_p13 = pmov %p1404_p11 }
  0x77   : > { %v243_v0 = vld [vmem:[%s202_s4] sm:$0xff]  ;;  %v244_v1 = vld [vmem:[%s202_s4 + $0x8] sm:$0xff]  ;;  %s1025_s10 = smov 127   ;;  %s1026_s11 = smov 125   ;;  %vm283_vm0 = vcmask 7168   ;;  %vm292_vm1 = vcmask 146432  }
  0x78   : > { %999 = vsyncadd (%p1405_p13), [#allocation6], 4294967040  ;;  %v819_v2 = vpack.i.bf16 %v244_v1, %v243_v0  ;;  %s1027_s26 = smov 126   ;;  %s1028_s18 = smov 1   ;;  %v301_v9 = vld [vmem:[%s1255_s29] sm:$0xff]  ;;  %vm309_vm2 = vcmask 523264  }
  0x79   : > { %v305_v10 = vld [vmem:[%s1255_s29 + $0x20] sm:$0xff]  ;;  %vm1272_vm3 = vmpackc.low %vm292_vm1, %vm292_vm1  ;;  %703 = vmatprep.mubr.msk.f32.mxu0 %vm309_vm2, %v301_v9  ;;  %v302_v33 = vld [vmem:[%s1255_s29 + $0x8] sm:$0xff]  ;;  %s1029_s30 = smov 2   ;;  %s1030_s6 = smov 3   ;;  %vm483_vm4 = vcmask 154648   ;;  %vm510_vm5 = vcmask 130048  }
  0x7a   : > { %820 = vrot.lane.b32.xlu0 %v819_v2, %s1025_s10  ;;  %830 = vrot.lane.b32.xlu1 %v819_v2, %s1026_s11  ;;  %v306_v34 = vld [vmem:[%s1255_s29 + $0x28] sm:$0xff]  ;;  %v303_v35 = vld [vmem:[%s1255_s29 + $0x10] sm:$0xff]  ;;  %v469_v48 = vld [vmem:[#allocation7] sm:$0xff]  ;;  %s242_s27 = scalar_lea.vmem [#allocation8], %s643_s25  ;;  %s670_s7 = sshll.u32 %s1075_s16, 8 }
  0x7b   : > { %709 = vmatprep.mubr.msk.f32.mxu1 %vm309_vm2, %v305_v10  ;;  %v307_v36 = vld [vmem:[%s1255_s29 + $0x30] sm:$0xff]  ;;  %v304_v37 = vld [vmem:[%s1255_s29 + $0x18] sm:$0xff]  ;;  %v470_v47 = vld [vmem:[#allocation7 + $0x8] sm:$0xff]  ;;  %s527_s5 = sshll.u32 %s242_s27, 4  ;;  %s1342_s23 = scalar_lea.hbm %s1389_s3, %s670_s7  ;;  %s1337_s5 = int_to_ptr.vmem [resolvable:$true] %s527_s5 }
  0x7c   : > { %v308_v38 = vld [vmem:[%s1255_s29 + $0x38] sm:$0xff]  ;;  %s514_s4 = scalar_lea.sflag [#allocation4], %s1243_s0  ;;  %s944_s20 = scalar_lea.vmem %s1337_s5, 256 }
  0x7d   : > { %p945_p3 = scmp.ne.s32.totalorder %s1337_s5, %s944_s20  ;;  %s1031_s16 = smov [#allocation8]  }
  0x7e   : > { %825 = vrot.lane.b32.xlu0 %v819_v2, %s1027_s26  ;;  %835 = vrot.lane.b32.xlu1 %v819_v2, %s1028_s18  ;;  %s948_s25 = sshll.u32 %s1031_s16, 4  ;;  %s949_s25 = int_to_ptr.vmem [resolvable:$false] %s948_s25 }
  0x7f   : > { %p946_p7 = pnand %p945_p3, %p1148_p12  ;;  %s950_s8 = scalar_lea.vmem %s949_s25, 512 }
  0x80   : > { %p951_p1 = scmp.lt.s32.totalorder %s1337_s5, %s949_s25  ;;  %p952_p5 = scmp.lt.s32.totalorder %s950_s8, %s944_s20 }
  0x81   : > { %p947_p9 = pneg %p946_p7 }
  0x82   : > { %p953_p2 = por %p952_p5, %p951_p1 }
  0x84   : > { %p954_p6 = pnand %p953_p2, %p947_p9 }
  0xec   : > { %v821_v3 = vpop.permute.xlu0 %820  ;;  %v831_v4 = vpop.permute.xlu1 %830 }
  0xed   : > { %840 = vrot.lane.b32.xlu0 %v821_v3, %s1028_s18 }
  0xf0   : > { %v826_v5 = vpop.permute.xlu0 %825  ;;  %v836_v6 = vpop.permute.xlu1 %835 }
  0xf1   : > { %v838_v7 = vunpack.i.h.bf16 %v836_v6  ;;  %v837_v8 = vunpack.i.l.bf16 %v836_v6  ;;  %845 = vrot.lane.b32.xlu1 %v826_v5, %s1028_s18  ;;  %850 = vrot.lane.b32.xlu0 %v831_v4, %s1028_s18 }
  0xf3   : > { %v285_v11 = vsel %vm283_vm0, 0.0, %v838_v7  ;;  %v284_v12 = vsel %vm283_vm0, 0.0, %v837_v8 }
  0xf4   : > { %v715_v14 = vpack.c.bf16 %v285_v11, %v284_v12 }
  0xf6   : > { %717 = vmatprep.subr.msk.bf16.mxu0 %vm1272_vm3, %v715_v14  ;;  %739 = vmatprep.subr.msk.bf16.mxu1 %vm1272_vm3, %v715_v14 }
  0xf7   : > { %720 = vmatpush3.bf16.msk.msra.mxu0 %vm1272_vm3, %v715_v14  ;;  %743 = vmatpush3.bf16.msk.msra.mxu1 %vm1272_vm3, %v715_v14 }
 0x15f   : > { %v841_v15 = vpop.permute.xlu0 %840 }
 0x160   : > { %v843_v16 = vunpack.i.h.bf16 %v841_v15  ;;  %v842_v17 = vunpack.i.l.bf16 %v841_v15 }
 0x162   : > { %v287_v18 = vsel %vm283_vm0, 0.0, %v843_v16  ;;  %v286_v19 = vsel %vm283_vm0, 0.0, %v842_v17 }
 0x163   : > { %v721_v20 = vpack.c.bf16 %v287_v18, %v286_v19  ;;  %v846_v21 = vpop.permute.xlu1 %845  ;;  %v851_v22 = vpop.permute.xlu0 %850 }
 0x164   : > { %v848_v23 = vunpack.i.h.bf16 %v846_v21  ;;  %v847_v24 = vunpack.i.l.bf16 %v846_v21  ;;  %v853_v25 = vunpack.i.h.bf16 %v851_v22  ;;  %v852_v26 = vunpack.i.l.bf16 %v851_v22 }
 0x165   : > { %723 = vmatprep.subr.msk.bf16.mxu0 %vm1272_vm3, %v721_v20  ;;  %740 = vmatprep.subr.msk.bf16.mxu1 %vm1272_vm3, %v721_v20 }
 0x166   : > { %v289_v27 = vsel %vm283_vm0, 0.0, %v848_v23  ;;  %v288_v28 = vsel %vm283_vm0, 0.0, %v847_v24  ;;  %726 = vmatpush3.bf16.msk.msra.mxu0 %vm1272_vm3, %v721_v20  ;;  %744 = vmatpush3.bf16.msk.msra.mxu1 %vm1272_vm3, %v721_v20  ;;  %v291_v29 = vsel %vm283_vm0, 0.0, %v853_v25  ;;  %v290_v30 = vsel %vm283_vm0, 0.0, %v852_v26 }
 0x167   : > { %v727_v31 = vpack.c.bf16 %v289_v27, %v288_v28  ;;  %v733_v32 = vpack.c.bf16 %v291_v29, %v290_v30 }
 0x169   : > { %729 = vmatprep.subr.msk.bf16.mxu0 %vm1272_vm3, %v727_v31  ;;  %741 = vmatprep.subr.msk.bf16.mxu1 %vm1272_vm3, %v727_v31 }
 0x16a   : > { %732 = vmatpush3.bf16.msk.msra.mxu0 %vm1272_vm3, %v727_v31  ;;  %745 = vmatpush3.bf16.msk.msra.mxu1 %vm1272_vm3, %v727_v31 }
 0x16b   : > { %735 = vmatprep.subr.msk.bf16.mxu0 %vm1272_vm3, %v733_v32  ;;  %742 = vmatprep.subr.msk.bf16.mxu1 %vm1272_vm3, %v733_v32 }
 0x16e   : > { %738 = vmatpush3.bf16.msk.msra.mxu0 %vm1272_vm3, %v733_v32  ;;  %746 = vmatpush3.bf16.msk.msra.mxu1 %vm1272_vm3, %v733_v32 }
 0x171   : > { %704 = vmatmul.mubr.msk.f32.vlgmr.msra.gmra.mrb[0].mxu0 %vm309_vm2, %v302_v33  ;;  %710 = vmatmul.mubr.msk.f32.vlgmr.msra.gmra.mrb[0].mxu1 %vm309_vm2, %v306_v34 }
 0x172   : > { %706 = vmatprep.mubr.msk.f32.mxu0 %vm309_vm2, %v303_v35  ;;  %712 = vmatprep.mubr.msk.f32.mxu1 %vm309_vm2, %v307_v36 }
 0x175   : > { %707 = vmatmul.mubr.msk.f32.gmra.mrb[2].mxu0 %vm309_vm2, %v304_v37  ;;  %713 = vmatmul.mubr.msk.f32.gmra.mrb[2].mxu1 %vm309_vm2, %v308_v38 }
 0x244   : > { %v705_v39 = vpop.f32.mrb[0].mxu0  ;;  %v711_v40 = vpop.f32.mrb[0].mxu1 }
 0x245   : > { %453 = vrot.lane.b32.xlu0 %v711_v40, %s1029_s30  ;;  %v400_v41 = vpop.f32.mrb[1].mxu0  ;;  %v420_v42 = vpop.f32.mrb[1].mxu1 }
 0x246   : > { %451 = vrot.lane.b32.xlu1 %v420_v42, %s1029_s30 }
 0x248   : > { %v708_v43 = vpop.f32.mrb[2].mxu0  ;;  %v714_v44 = vpop.f32.mrb[2].mxu1 }
 0x249   : > { %443 = vrot.lane.b32.xlu0 %v708_v43, %s1028_s18  ;;  %v410_v45 = vpop.f32.mrb[3].mxu0  ;;  %v430_v46 = vpop.f32.mrb[3].mxu1 }
 0x24a   : > { %441 = vrot.lane.b32.xlu1 %v410_v45, %s1028_s18 }
 0x24d   : > { %463 = vrot.lane.b32.xlu0 %v714_v44, %s1030_s6 }
 0x24e   : > { %461 = vrot.lane.b32.xlu1 %v430_v46, %s1030_s6 }
 0x251   : > { %475 = vrot.lane.b32.xlu0 %v470_v47, %s1030_s6 }
 0x252   : > { %473 = vrot.lane.b32.xlu1 %v469_v48, %s1030_s6 }
 0x2b7   : > { %v454_v49 = vpop.permute.xlu0 %453 }
 0x2b8   : > { %v452_v50 = vpop.permute.xlu1 %451 }
 0x2bb   : > { %v444_v51 = vpop.permute.xlu0 %443 }
 0x2bc   : > { %v448_v52 = vadd.f32 %v705_v39, %v444_v51  ;;  %v442_v53 = vpop.permute.xlu1 %441 }
 0x2bd   : > { %v447_v54 = vadd.f32 %v442_v53, %v400_v41 }
 0x2be   : > { %v458_v55 = vadd.f32 %v454_v49, %v448_v52 }
 0x2bf   : > { %v464_v56 = vpop.permute.xlu0 %463  ;;  %v457_v57 = vadd.f32 %v452_v50, %v447_v54 }
 0x2c0   : > { %v462_v58 = vpop.permute.xlu1 %461  ;;  %v468_v59 = vadd.f32 %v464_v56, %v458_v55 }
 0x2c1   : > { %v467_v60 = vadd.f32 %v462_v58, %v457_v57 }
 0x2c3   : > { %v476_v61 = vpop.permute.xlu0 %475 }
 0x2c4   : > { %v480_v62 = vmul.f32 %v476_v61, %v468_v59  ;;  %v474_v63 = vpop.permute.xlu1 %473 }
 0x2c5   : > { %v479_v0 = vmul.f32 %v474_v63, %v467_v60 }
 0x2c6   : > { %v482_v1 = vand.u32 2147483647, %v480_v62 }
 0x2c7   : > { %v481_v2 = vand.u32 2147483647, %v479_v0 }
 0x2c8   : > { %v487_v3 = vsel %vm483_vm4, %v482_v1, -inf }
 0x2c9   : > { %488 = vmax.xlane.f32.xlu0 %v487_v3  ;;  %v484_v4 = vsel %vm483_vm4, %v481_v2, -inf }
 0x2ca   : > { %485 = vmax.xlane.f32.xlu1 %v484_v4 }
 0x356   : > { %v489_v5 = vpop.xlane.xlu0 %488 }
 0x357   : > { %v486_v6 = vpop.xlane.xlu1 %485 }
 0x358   : > { %v490_v7 = vmax.f32 %v486_v6, %v489_v5 }
 0x35a   : > { %v491_v8 = vrot.slane %v490_v7, 4 }
 0x35c   : > { %v492_v9 = vmax.f32 %v490_v7, %v491_v8 }
 0x35e   : > { %v493_v10 = vrot.slane %v492_v9, 2 }
 0x360   : > { %v494_v11 = vmax.f32 %v492_v9, %v493_v10 }
 0x362   : > { %v495_v12 = vrot.slane %v494_v11, 1 }
 0x364   : > { %v496_v13 = vmax.f32 %v494_v11, %v495_v12 }
 0x366   : > { %v497_v14 = vmax.f32 %v496_v13, 1e-07 }
 0x368   : > { %854 = vrcp.f32 %v497_v14 }
 0x372   : > { %v855_v15 = vpop.eup %854 }
 0x373   : > { %v501_v16 = vmul.f32 %v855_v15, %v480_v62  ;;  %v500_v17 = vmul.f32 %v855_v15, %v479_v0 }
 0x375   : > { %506 = vrot.lane.b32.xlu1 %v501_v16, %s1026_s11  ;;  %504 = vrot.lane.b32.xlu0 %v500_v17, %s1026_s11 }
 0x3e7   : > { %v507_v18 = vpop.permute.xlu1 %506  ;;  %v505_v19 = vpop.permute.xlu0 %504 }
 0x3e8   : > { %512 = vst.msk [vmem:[%s242_s27 + $0x8] sm:$0xff] %vm510_vm5, %v507_v18  ;;  %511 = vst.msk [vmem:[%s242_s27] sm:$0xff] %vm510_vm5, %v505_v19 }
 0x3e9   : > { %957 = shalt.err (!%p954_p6)
}
 0x3ea   : > { %s958_s9 = scalar_lea.hbm %s1342_s23, 256  ;;  %s962_s11 = scalar_lea.hbm %s1389_s3, 512 }
 0x3eb   : > { %p959_p8 = scmp.ne.s32.totalorder %s1342_s23, %s958_s9  ;;  %p963_p4 = scmp.lt.u32.totalorder %s1342_s23, %s1389_s3 }
 0x3ec   : > { %p964_p11 = scmp.lt.u32.totalorder %s962_s11, %s958_s9  ;;  %p966_p3 = scmp.lt.u32.totalorder %s958_s9, %s1342_s23 }
 0x3ed   : > { %p960_p10 = pnand %p959_p8, %p1148_p12 }
 0x3ee   : > { %p965_p13 = por %p964_p11, %p963_p4 }
 0x3ef   : > { %p961_p0 = pneg %p960_p10 }
 0x3f0   : > { %p967_p7 = por %p966_p3, %p965_p13 }
 0x3f2   : > { %p968_p9 = pnand %p967_p7, %p961_p0 }
 0x3f4   : > { %971 = shalt.err (!%p968_p9)
}
 0x3f5   : > { %s1032_s30 = smov 128   ;;  %s1033_s6 = smov 8  }
 0x3f6   : > { %755 = dma.vmem_to_hbm [thread:$0]  (%p1148_p12), %s1337_s5, 256, %s1342_s23, %s514_s4, %s1032_s30, %s1032_s30, %s1033_s6  }
 0x3f7 PF: > { %s542_s27 = sand.u32 1, %s1006_s12   ;;  %p1408_p1 = scmp.ne.s32.totalorder %s1395_s19, 0 }
 0x3f8   : > { %p1409_p5 = scmp.ge.s32.totalorder %s1018_s15, 2  ;;  %s543_s7 = scalar_lea.sflag [#allocation4], %s542_s27 }
 0x3fa   : > { %p769_p2 = pnand %p1409_p5, %p1408_p1 }
 0x3fc   : > { %1001 = dma.done.wait (!%p769_p2), %s543_s7, 256  }
 0x3fd   : > { %1003 = vsyncadd (!%p769_p2), %s543_s7, 4294967040  ;;  %p19_p6 = scmp.ge.s32.totalorder %s1110_s24, 4   ;;  %s1410_s12 = smov %s1010_s13 }
 0x3fe   : > { %s1411_s13 = smov %s1014_s14  ;;  %s1412_s14 = smov %s1144_s17 }
 0x3ff   : > { %s1413_s15 = smov %s1110_s24  ;;  %21 = sbr.rel (!%p19_p6) target bundleno = 9 (0x9), region = 94 }
 0x406   :  { %548 = vsyncpa [#allocation3], 1 }
 0x407   :  { %550 = vsyncpa [#allocation3 + $0x1], 1 }
 0x408   :  { %551 = vsyncpa [#allocation6], 1 }
 0x409   :  { %553 = vsyncpa [#allocation6 + $0x1], 1 }
 0x40a   :  { %554 = vsyncpa [#allocation4], 1 }
 0x40b   :  { %556 = vsyncpa [#allocation4 + $0x1], 1 }

</bundles_post_ra>
